<compile_context>
chip_gen: v7x
topology: tpu7x:2x2x1
jax: 0.10.0
libtpu: 0.0.40
codegen_flags: <defaults>
</compile_context>

<pallas_src>
import math

import jax
import jax.numpy as jnp
from jax.experimental import pallas as pl
from jax.experimental.pallas import tpu as pltpu

_SQRT2 = math.sqrt(2.0)
_SQRT_2_OVER_PI = math.sqrt(2.0 / math.pi)
_LN_EPS = 1e-5


def _round_up(x, m):
    return ((x + m - 1) // m) * m


def _gelu(x, approx):
    if approx:
        # tanh approximation lowers to the EUP slot (frees VPU); optional.
        return 0.5 * x * (1.0 + jnp.tanh(_SQRT_2_OVER_PI * (x + 0.044715 * x * x * x)))
    # exact GELU, matches torch.nn.GELU(approximate='none'). Keep in f32.
    return 0.5 * x * (1.0 + jax.lax.erf(x / _SQRT2))


# ---------------- device-generation helpers ----------------

def _device_kind():
    try:
        return jax.devices()[0].device_kind.lower()
    except Exception:
        return ""


def _default_vmem_limit_bytes():
    kind = _device_kind()
    if "v7" in kind:
        return 48 * 1024 * 1024          # v7x: 64 MiB physical per TensorCore
    if any(t in kind for t in ("v4", "v5", "v6")):
        return 96 * 1024 * 1024          # 128 MiB physical
    return None                          # unknown chip: keep compiler default


def _tensorcores_per_chip():
    return 2 if "v7" in _device_kind() else 1


# ---------------- one-time parameter preparation ----------------

class PreparedMLP:
    """One-time padded / dtype-cast parameters (do NOT re-pad per forward)."""

    def __init__(self, layers, layer_norm, dot_dtype):
        # layers: [(w_pad[din_p, dout_p] in dot_dtype,
        #           vec[rows, dout_p] f32 (row0=bias, row1=gamma, row2=beta),
        #           d_in, d_out)]
        self.layers = layers
        self.layer_norm = layer_norm
        self.dot_dtype = dot_dtype

    @property
    def param_bytes(self):
        return sum(w.size * w.dtype.itemsize + v.size * v.dtype.itemsize
                   for (w, v, _, _) in self.layers)


def prepare_mlp_params(params, *, dot_dtype=jnp.float32):
    """params: list of (w[d_in,d_out], b, gamma|None, beta|None)."""
    layer_norm = params[0][2] is not None
    layers = []
    for (w, b, gamma, beta) in params:
        d_in, d_out = int(w.shape[0]), int(w.shape[1])
        din_p, dout_p = _round_up(d_in, 128), _round_up(d_out, 128)
        w_pad = jnp.zeros((din_p, dout_p), dot_dtype).at[:d_in, :d_out].set(
            w.astype(dot_dtype))
        rows = 3 if layer_norm else 1
        vec = jnp.zeros((rows, dout_p), jnp.float32)
        vec = vec.at[0, :d_out].set(b.astype(jnp.float32))
        if layer_norm:
            vec = vec.at[1, :d_out].set(gamma.astype(jnp.float32))
            vec = vec.at[2, :d_out].set(beta.astype(jnp.float32))
        layers.append((w_pad, vec, d_in, d_out))
    return PreparedMLP(layers, layer_norm, dot_dtype)


# ---------------- fused kernel (all layers in one call) ----------------

def _make_kernel(layer_meta, layer_norm, dot_dtype, approx_gelu):
    """layer_meta: tuple of (d_out_real, d_out_padded) per layer."""
    n_layers = len(layer_meta)

    def kernel(x_ref, *refs):
        o_ref = refs[-1]
        p_refs = refs[:-1]                      # [w0, vec0, w1, vec1, ...]
        y = x_ref[...]                          # (b_tile, din0_p) f32
        for li in range(n_layers):              # unrolled at trace time (small)
            w_ref = p_refs[2 * li]
            v_ref = p_refs[2 * li + 1]
            d_out, dout_p = layer_meta[li]
            # MXU matmul; weights already stored in dot_dtype, f32 accumulation.
            y = jnp.dot(y.astype(dot_dtype), w_ref[...],
                        preferred_element_type=jnp.float32)
            v = v_ref[...]                      # (rows, dout_p) f32
            y = y + v[0:1, :]                   # bias (broadcast over batch)
            y = _gelu(y, approx_gelu)           # f32 elementwise
            if layer_norm:
                inv_d = jnp.float32(1.0 / d_out)
                # Padded lanes are exactly 0 (zero weight cols, zero bias,
                # GELU(0)=0), so full-width sums equal sums over real lanes.
                mean = jnp.sum(y, axis=-1, keepdims=True) * inv_d
                yc = y - mean
                if d_out != dout_p:
                    lane = jax.lax.broadcasted_iota(jnp.int32, (1, dout_p), 1)
                    yc = jnp.where(lane < d_out, yc, 0.0)   # keep padded lanes 0
                var = jnp.sum(yc * yc, axis=-1, keepdims=True) * inv_d
                y = yc * jax.lax.rsqrt(var + _LN_EPS)
                y = y * v[1:2, :] + v[2:3, :]   # gamma/beta (0 in padded lanes)
        o_ref[...] = y.astype(o_ref.dtype)

    return kernel


def _fused_call(x_pad, prep, b_tile, out_dtype, vmem_limit, single_buffer_consts,
                approx_gelu):
    b_pad, din0_p = x_pad.shape
    dout_last_p = prep.layers[-1][0].shape[1]
    grid = (b_pad // b_tile,)

    def _const_spec(shape):
        if single_buffer_consts:
            # Constant across the batch grid -> a single buffer is enough.
            return pl.BlockSpec(shape, lambda i: (0, 0),
                                pipeline_mode=pl.Buffered(1))
        return pl.BlockSpec(shape, lambda i: (0, 0))

    in_specs = [pl.BlockSpec((b_tile, din0_p), lambda i: (i, 0))]
    flat = [x_pad]
    for (w_pad, vec, _, _) in prep.layers:
        flat += [w_pad, vec]
        in_specs += [_const_spec(w_pad.shape), _const_spec(vec.shape)]

    layer_meta = tuple((d_out, w_pad.shape[1])
                       for (w_pad, _, _, d_out) in prep.layers)
    kernel = _make_kernel(layer_meta, prep.layer_norm, prep.dot_dtype, approx_gelu)

    cp_kwargs = dict(dimension_semantics=("parallel",))
    if vmem_limit is not None:
        cp_kwargs["vmem_limit_bytes"] = int(vmem_limit)

    return pl.pallas_call(
        kernel,
        grid=grid,
        in_specs=in_specs,
        out_specs=pl.BlockSpec((b_tile, dout_last_p), lambda i: (i, 0)),
        out_shape=jax.ShapeDtypeStruct((b_pad, dout_last_p), out_dtype),
        compiler_params=pltpu.CompilerParams(**cp_kwargs),
    )(*flat)


# ---------------- wrapper ----------------

_SINGLE_BUFFER_CONSTS_OK = None   # lazily probed pl.Buffered(1) support


def mlp_forward(x, prepared, *, batch_tile=512, approx_gelu=False,
                vmem_limit_bytes=None):
    """Fused MLP forward. `prepared` comes from prepare_mlp_params()."""
    global _SINGLE_BUFFER_CONSTS_OK

    B, d_in0 = x.shape
    assert d_in0 == prepared.layers[0][2], "input width mismatch"
    d_out_last = prepared.layers[-1][3]
    din0_p = prepared.layers[0][0].shape[0]
    dout_last_p = prepared.layers[-1][0].shape[1]
    out_dtype = x.dtype

    vmem_limit = (_default_vmem_limit_bytes() if vmem_limit_bytes is None
                  else vmem_limit_bytes)
    budget = 0.7 * (vmem_limit if vmem_limit is not None else 32 * 1024 * 1024)

    # Batch tile: big enough to feed the MXU, small enough for VMEM; on a
    # 2-TensorCore chip (v7x) make sure there are >= 2 "parallel" grid steps.
    b_rows = _round_up(B, 8)
    b_tile = min(b_rows, _round_up(batch_tile, 8))
    n_tc = _tensorcores_per_chip()
    if n_tc > 1 and b_rows >= 2 * 8:
        b_tile = min(b_tile, _round_up(pl.cdiv(b_rows, n_tc), 8))

    def _footprint(bt):
        max_dp = max(max(w.shape) for (w, _, _, _) in prepared.layers)
        act = 3 * bt * max_dp * 4                               # live f32 activations
        io = 2 * bt * din0_p * 4 + 2 * bt * dout_last_p * jnp.dtype(out_dtype).itemsize
        return 2 * prepared.param_bytes + act + io              # 2x: worst-case buffering

    while _footprint(b_tile) > budget and b_tile > 128:
        b_tile = _round_up(b_tile // 2, 8)

    # VMEM-cliff fallback (matters on v7x's 64 MiB): if the whole network's
    # weights cannot stay resident, run one fused layer per pallas_call.
    # TODO(synk): add a K/N-tiled accumulator path for single layers too wide to fit VMEM.
    if _footprint(b_tile) > budget and len(prepared.layers) > 1:
        y = x
        for layer in prepared.layers:
            sub = PreparedMLP([layer], prepared.layer_norm, prepared.dot_dtype)
            y = mlp_forward(y, sub, batch_tile=batch_tile, approx_gelu=approx_gelu,
                            vmem_limit_bytes=vmem_limit_bytes)
        return y

    b_pad = _round_up(b_rows, b_tile)
    x_pad = jnp.zeros((b_pad, din0_p), jnp.float32).at[:B, :d_in0].set(
        x.astype(jnp.float32))

    candidates = ([True, False] if _SINGLE_BUFFER_CONSTS_OK is None
                  else [_SINGLE_BUFFER_CONSTS_OK])
    out_pad = None
    for idx, sb in enumerate(candidates):
        try:
            out_pad = _fused_call(x_pad, prepared, b_tile, out_dtype, vmem_limit,
                                  sb, approx_gelu)
            _SINGLE_BUFFER_CONSTS_OK = sb
            break
        except Exception:
            if idx == len(candidates) - 1:
                raise
    return out_pad[:B, :d_out_last]


# ---------------- params & pure-JAX reference ----------------

def init_mlp_params(key, hidden_dims, layer_norm=False):
    """Deterministic init mirroring nn.Linear / nn.LayerNorm defaults.
    Weights stored as [d_in, d_out] (transposed vs. PyTorch's [out, in])."""
    params = []
    for i in range(len(hidden_dims) - 1):
        d_in, d_out = hidden_dims[i], hidden_dims[i + 1]
        key, kw, kb = jax.random.split(key, 3)
        bound = 1.0 / math.sqrt(d_in)
        w = jax.random.uniform(kw, (d_in, d_out), jnp.float32, -bound, bound)
        b = jax.random.uniform(kb, (d_out,), jnp.float32, -bound, bound)
        if layer_norm:
            params.append((w, b, jnp.ones((d_out,), jnp.float32),
                           jnp.zeros((d_out,), jnp.float32)))
        else:
            params.append((w, b, None, None))
    return params


def mlp_forward_ref(x, params, *, dot_dtype=jnp.float32):
    """Pure-JAX reference mirroring the PyTorch module semantics."""
    for (w, b, gamma, beta) in params:
        y = jnp.dot(x.astype(dot_dtype), w.astype(dot_dtype),
                    preferred_element_type=jnp.float32) + b
        y = _gelu(y, approx=False)
        if gamma is not None:
            mean = jnp.mean(y, axis=-1, keepdims=True)
            var = jnp.mean(jnp.square(y - mean), axis=-1, keepdims=True)
            y = (y - mean) * jax.lax.rsqrt(var + _LN_EPS)
            y = y * gamma + beta
        x = y
    return x


if __name__ == "__main__":
    key = jax.random.PRNGKey(0)
    kx, kp = jax.random.split(key)

    hidden_dims = (32, 64, 32)   # MLP(hidden_dims=[32, 64, 32])
    B = 8
    x = jax.random.normal(kx, (B, hidden_dims[0]), jnp.float32)

    params_plain = init_mlp_params(kp, hidden_dims, layer_norm=False)
    params_ln = init_mlp_params(kp, hidden_dims, layer_norm=True)

    # One-time parameter preparation (padding / dtype cast hoisted out of forward).
    prep_plain = prepare_mlp_params(params_plain)                        # exact f32 matmul
    prep_ln = prepare_mlp_params(params_ln)
    prep_ln_bf16 = prepare_mlp_params(params_ln, dot_dtype=jnp.bfloat16)  # bf16 MXU path

    out_plain = jax.block_until_ready(mlp_forward(x, prep_plain))
    out_ln = jax.block_until_ready(mlp_forward(x, prep_ln))
    out_bf16 = jax.block_until_ready(mlp_forward(x, prep_ln_bf16))

    ref_plain = mlp_forward_ref(x, params_plain)
    ref_ln = mlp_forward_ref(x, params_ln)
    ref_bf16 = mlp_forward_ref(x, params_ln, dot_dtype=jnp.bfloat16)

    assert out_plain.shape == (B, hidden_dims[-1])
    assert out_ln.shape == (B, hidden_dims[-1])
    assert jnp.allclose(out_plain, ref_plain, atol=1e-5, rtol=1e-5)
    assert jnp.allclose(out_ln, ref_ln, atol=1e-5, rtol=1e-5)
    assert jnp.allclose(out_bf16, ref_bf16, atol=2e-2, rtol=2e-2)

    print("KERNEL_OK")
</pallas_src>

<mosaic_0001>
module attributes {stable_mosaic.version = 11 : i64} {
  func.func @kernel(%arg0: i32, %arg1: memref<8x128xf32, #tpu.memory_space<vmem>>, %arg2: memref<128x128xf32, #tpu.memory_space<vmem>>, %arg3: memref<1x128xf32, #tpu.memory_space<vmem>>, %arg4: memref<128x128xf32, #tpu.memory_space<vmem>>, %arg5: memref<1x128xf32, #tpu.memory_space<vmem>>, %arg6: memref<8x128xf32, #tpu.memory_space<vmem>>) attributes {dimension_semantics = [#tpu.dimension_semantics<parallel>], iteration_bounds = array<i64: 1>, scalar_prefetch = 0 : i64, scratch_operands = 0 : i64, tpu.core_type = #tpu.core_type<tc>, window_params = [{transform_indices = @transform_0, window_bounds = array<i64: 8, 128>}, {pipeline_mode = #tpu.pipeline_mode<synchronous>, transform_indices = @transform_1, window_bounds = array<i64: 128, 128>}, {pipeline_mode = #tpu.pipeline_mode<synchronous>, transform_indices = @transform_2, window_bounds = array<i64: 1, 128>}, {pipeline_mode = #tpu.pipeline_mode<synchronous>, transform_indices = @transform_3, window_bounds = array<i64: 128, 128>}, {pipeline_mode = #tpu.pipeline_mode<synchronous>, transform_indices = @transform_4, window_bounds = array<i64: 1, 128>}, {transform_indices = @transform_5, window_bounds = array<i64: 8, 128>}]} {
    %c0 = arith.constant 0 : index
    %c0_0 = arith.constant 0 : index
    %0 = vector.load %arg1[%c0, %c0_0] : memref<8x128xf32, #tpu.memory_space<vmem>>, vector<8x128xf32>
    %c0_1 = arith.constant 0 : index
    %c0_2 = arith.constant 0 : index
    %1 = vector.load %arg2[%c0_1, %c0_2] : memref<128x128xf32, #tpu.memory_space<vmem>>, vector<128x128xf32>
    %cst = arith.constant dense<0.000000e+00> : vector<8x128xf32>
    %2 = tpu.matmul %0, %1, %cst {dimension_numbers = #tpu.dot_dimension_numbers<[1], [0], [0], [1], [0, 0, 1, 1], [], []>} : vector<8x128xf32>, vector<128x128xf32>, vector<8x128xf32> -> vector<8x128xf32>
    %c0_3 = arith.constant 0 : index
    %c0_4 = arith.constant 0 : index
    %3 = vector.load %arg3[%c0_3, %c0_4] : memref<1x128xf32, #tpu.memory_space<vmem>>, vector<1x128xf32>
    %4 = vector.broadcast %3 : vector<1x128xf32> to vector<8x128xf32>
    %5 = arith.addf %2, %4 : vector<8x128xf32>
    %cst_5 = arith.constant 5.000000e-01 : f32
    %6 = vector.broadcast %cst_5 : f32 to vector<8x128xf32>
    %7 = arith.mulf %6, %5 : vector<8x128xf32>
    %cst_6 = arith.constant 1.41421354 : f32
    %8 = vector.broadcast %cst_6 : f32 to vector<8x128xf32>
    %9 = arith.divf %5, %8 : vector<8x128xf32>
    %10 = math.erf %9 : vector<8x128xf32>
    %cst_7 = arith.constant 1.000000e+00 : f32
    %11 = vector.broadcast %cst_7 : f32 to vector<8x128xf32>
    %12 = arith.addf %11, %10 : vector<8x128xf32>
    %13 = arith.mulf %7, %12 : vector<8x128xf32>
    %c0_8 = arith.constant 0 : index
    %c0_9 = arith.constant 0 : index
    %14 = vector.load %arg4[%c0_8, %c0_9] : memref<128x128xf32, #tpu.memory_space<vmem>>, vector<128x128xf32>
    %cst_10 = arith.constant dense<0.000000e+00> : vector<8x128xf32>
    %15 = tpu.matmul %13, %14, %cst_10 {dimension_numbers = #tpu.dot_dimension_numbers<[1], [0], [0], [1], [0, 0, 1, 1], [], []>} : vector<8x128xf32>, vector<128x128xf32>, vector<8x128xf32> -> vector<8x128xf32>
    %c0_11 = arith.constant 0 : index
    %c0_12 = arith.constant 0 : index
    %16 = vector.load %arg5[%c0_11, %c0_12] : memref<1x128xf32, #tpu.memory_space<vmem>>, vector<1x128xf32>
    %17 = vector.broadcast %16 : vector<1x128xf32> to vector<8x128xf32>
    %18 = arith.addf %15, %17 : vector<8x128xf32>
    %cst_13 = arith.constant 5.000000e-01 : f32
    %19 = vector.broadcast %cst_13 : f32 to vector<8x128xf32>
    %20 = arith.mulf %19, %18 : vector<8x128xf32>
    %cst_14 = arith.constant 1.41421354 : f32
    %21 = vector.broadcast %cst_14 : f32 to vector<8x128xf32>
    %22 = arith.divf %18, %21 : vector<8x128xf32>
    %23 = math.erf %22 : vector<8x128xf32>
    %cst_15 = arith.constant 1.000000e+00 : f32
    %24 = vector.broadcast %cst_15 : f32 to vector<8x128xf32>
    %25 = arith.addf %24, %23 : vector<8x128xf32>
    %26 = arith.mulf %20, %25 : vector<8x128xf32>
    %c0_16 = arith.constant 0 : index
    %c0_17 = arith.constant 0 : index
    %27 = vector.load %arg6[%c0_16, %c0_17] : memref<8x128xf32, #tpu.memory_space<vmem>>, vector<8x128xf32>
    tpu.vector_store %arg6[%c0_16, %c0_17], %26 {strides = array<i32>} : memref<8x128xf32, #tpu.memory_space<vmem>>, vector<8x128xf32>,
    return
  }
  func.func @transform_0(%arg0: i32) -> (i32, i32) {
    %c0_i32 = arith.constant 0 : i32
    %c0_i32_0 = arith.constant 0 : i32
    return %arg0, %c0_i32 : i32, i32
  }
  func.func @transform_1(%arg0: i32) -> (i32, i32) {
    %c0_i32 = arith.constant 0 : i32
    %c0_i32_0 = arith.constant 0 : i32
    %c0_i32_1 = arith.constant 0 : i32
    return %c0_i32, %c0_i32_0 : i32, i32
  }
  func.func @transform_2(%arg0: i32) -> (i32, i32) {
    %c0_i32 = arith.constant 0 : i32
    %c0_i32_0 = arith.constant 0 : i32
    %c0_i32_1 = arith.constant 0 : i32
    return %c0_i32, %c0_i32_0 : i32, i32
  }
  func.func @transform_3(%arg0: i32) -> (i32, i32) {
    %c0_i32 = arith.constant 0 : i32
    %c0_i32_0 = arith.constant 0 : i32
    %c0_i32_1 = arith.constant 0 : i32
    return %c0_i32, %c0_i32_0 : i32, i32
  }
  func.func @transform_4(%arg0: i32) -> (i32, i32) {
    %c0_i32 = arith.constant 0 : i32
    %c0_i32_0 = arith.constant 0 : i32
    %c0_i32_1 = arith.constant 0 : i32
    return %c0_i32, %c0_i32_0 : i32, i32
  }
  func.func @transform_5(%arg0: i32) -> (i32, i32) {
    %c0_i32 = arith.constant 0 : i32
    %c0_i32_0 = arith.constant 0 : i32
    return %arg0, %c0_i32 : i32, i32
  }
}

module attributes {stable_mosaic.version = 11 : i64} {
  func.func @kernel(%arg0: i32, %arg1: memref<8x128xf32, #tpu.memory_space<vmem>>, %arg2: memref<128x128xf32, #tpu.memory_space<vmem>>, %arg3: memref<1x128xf32, #tpu.memory_space<vmem>>, %arg4: memref<128x128xf32, #tpu.memory_space<vmem>>, %arg5: memref<1x128xf32, #tpu.memory_space<vmem>>, %arg6: memref<8x128xf32, #tpu.memory_space<vmem>>) attributes {dimension_semantics = [#tpu.dimension_semantics<parallel>], iteration_bounds = array<i64: 1>, scalar_prefetch = 0 : i64, scratch_operands = 0 : i64, tpu.core_type = #tpu.core_type<tc>, window_params = [{transform_indices = @transform_0, window_bounds = array<i64: 8, 128>}, {pipeline_mode = #tpu.pipeline_mode<synchronous>, transform_indices = @transform_1, window_bounds = array<i64: 128, 128>}, {pipeline_mode = #tpu.pipeline_mode<synchronous>, transform_indices = @transform_2, window_bounds = array<i64: 1, 128>}, {pipeline_mode = #tpu.pipeline_mode<synchronous>, transform_indices = @transform_3, window_bounds = array<i64: 128, 128>}, {pipeline_mode = #tpu.pipeline_mode<synchronous>, transform_indices = @transform_4, window_bounds = array<i64: 1, 128>}, {transform_indices = @transform_5, window_bounds = array<i64: 8, 128>}]} {
    %c0 = arith.constant 0 : index
    %c0_0 = arith.constant 0 : index
    %0 = vector.load %arg1[%c0, %c0_0] : memref<8x128xf32, #tpu.memory_space<vmem>>, vector<8x128xf32>
    %c0_1 = arith.constant 0 : index
    %c0_2 = arith.constant 0 : index
    %1 = vector.load %arg2[%c0_1, %c0_2] : memref<128x128xf32, #tpu.memory_space<vmem>>, vector<128x128xf32>
    %cst = arith.constant dense<0.000000e+00> : vector<8x128xf32>
    %2 = tpu.matmul %0, %1, %cst {dimension_numbers = #tpu.dot_dimension_numbers<[1], [0], [0], [1], [0, 0, 1, 1], [], []>} : vector<8x128xf32>, vector<128x128xf32>, vector<8x128xf32> -> vector<8x128xf32>
    %c0_3 = arith.constant 0 : index
    %c0_4 = arith.constant 0 : index
    %3 = vector.load %arg3[%c0_3, %c0_4] : memref<1x128xf32, #tpu.memory_space<vmem>>, vector<1x128xf32>
    %4 = vector.broadcast %3 : vector<1x128xf32> to vector<8x128xf32>
    %5 = arith.addf %2, %4 : vector<8x128xf32>
    %cst_5 = arith.constant 5.000000e-01 : f32
    %6 = vector.broadcast %cst_5 : f32 to vector<8x128xf32>
    %7 = arith.mulf %6, %5 : vector<8x128xf32>
    %cst_6 = arith.constant 1.41421354 : f32
    %8 = vector.broadcast %cst_6 : f32 to vector<8x128xf32>
    %9 = arith.divf %5, %8 : vector<8x128xf32>
    %10 = math.erf %9 : vector<8x128xf32>
    %cst_7 = arith.constant 1.000000e+00 : f32
    %11 = vector.broadcast %cst_7 : f32 to vector<8x128xf32>
    %12 = arith.addf %11, %10 : vector<8x128xf32>
    %13 = arith.mulf %7, %12 : vector<8x128xf32>
    %c0_8 = arith.constant 0 : index
    %c0_9 = arith.constant 0 : index
    %14 = vector.load %arg4[%c0_8, %c0_9] : memref<128x128xf32, #tpu.memory_space<vmem>>, vector<128x128xf32>
    %cst_10 = arith.constant dense<0.000000e+00> : vector<8x128xf32>
    %15 = tpu.matmul %13, %14, %cst_10 {dimension_numbers = #tpu.dot_dimension_numbers<[1], [0], [0], [1], [0, 0, 1, 1], [], []>} : vector<8x128xf32>, vector<128x128xf32>, vector<8x128xf32> -> vector<8x128xf32>
    %c0_11 = arith.constant 0 : index
    %c0_12 = arith.constant 0 : index
    %16 = vector.load %arg5[%c0_11, %c0_12] : memref<1x128xf32, #tpu.memory_space<vmem>>, vector<1x128xf32>
    %17 = vector.broadcast %16 : vector<1x128xf32> to vector<8x128xf32>
    %18 = arith.addf %15, %17 : vector<8x128xf32>
    %cst_13 = arith.constant 5.000000e-01 : f32
    %19 = vector.broadcast %cst_13 : f32 to vector<8x128xf32>
    %20 = arith.mulf %19, %18 : vector<8x128xf32>
    %cst_14 = arith.constant 1.41421354 : f32
    %21 = vector.broadcast %cst_14 : f32 to vector<8x128xf32>
    %22 = arith.divf %18, %21 : vector<8x128xf32>
    %23 = math.erf %22 : vector<8x128xf32>
    %cst_15 = arith.constant 1.000000e+00 : f32
    %24 = vector.broadcast %cst_15 : f32 to vector<8x128xf32>
    %25 = arith.addf %24, %23 : vector<8x128xf32>
    %26 = arith.mulf %20, %25 : vector<8x128xf32>
    %c0_16 = arith.constant 0 : index
    %c0_17 = arith.constant 0 : index
    %27 = vector.load %arg6[%c0_16, %c0_17] : memref<8x128xf32, #tpu.memory_space<vmem>>, vector<8x128xf32>
    tpu.vector_store %arg6[%c0_16, %c0_17], %26 {strides = array<i32>} : memref<8x128xf32, #tpu.memory_space<vmem>>, vector<8x128xf32>,
    return
  }
  func.func @transform_0(%arg0: i32) -> (i32, i32) {
    %c0_i32 = arith.constant 0 : i32
    %c0_i32_0 = arith.constant 0 : i32
    return %arg0, %c0_i32 : i32, i32
  }
  func.func @transform_1(%arg0: i32) -> (i32, i32) {
    %c0_i32 = arith.constant 0 : i32
    %c0_i32_0 = arith.constant 0 : i32
    %c0_i32_1 = arith.constant 0 : i32
    return %c0_i32, %c0_i32_0 : i32, i32
  }
  func.func @transform_2(%arg0: i32) -> (i32, i32) {
    %c0_i32 = arith.constant 0 : i32
    %c0_i32_0 = arith.constant 0 : i32
    %c0_i32_1 = arith.constant 0 : i32
    return %c0_i32, %c0_i32_0 : i32, i32
  }
  func.func @transform_3(%arg0: i32) -> (i32, i32) {
    %c0_i32 = arith.constant 0 : i32
    %c0_i32_0 = arith.constant 0 : i32
    %c0_i32_1 = arith.constant 0 : i32
    return %c0_i32, %c0_i32_0 : i32, i32
  }
  func.func @transform_4(%arg0: i32) -> (i32, i32) {
    %c0_i32 = arith.constant 0 : i32
    %c0_i32_0 = arith.constant 0 : i32
    %c0_i32_1 = arith.constant 0 : i32
    return %c0_i32, %c0_i32_0 : i32, i32
  }
  func.func @transform_5(%arg0: i32) -> (i32, i32) {
    %c0_i32 = arith.constant 0 : i32
    %c0_i32_0 = arith.constant 0 : i32
    return %arg0, %c0_i32 : i32, i32
  }
}

</mosaic_0001>

<bundles_post_ra>
// kernel: tpu_custom_call.1
= control target key start
LH: loop header
LB: loop body
LE: loop exit
PB: predicated region body
PF: predicated region fallthrough
CT: control target
= control target key end

     0   :  { %10 = vsyncpa [#allocation3], 0  ;;  %s651_s0 = inlined_call_operand.hbm [shape: f32[8,128], index: 0, kind: input, shape index: {}]   ;;  %s652_s1 = inlined_call_operand.hbm [shape: f32[128,128], index: 1, kind: input, shape index: {}]   ;;  %s653_s2 = inlined_call_operand.vmem [shape: f32[1,128], index: 2, kind: input, shape index: {}]   ;;  %s654_s3 = inlined_call_operand.hbm [shape: f32[128,128], index: 3, kind: input, shape index: {}]   ;;  %s655_s4 = inlined_call_operand.vmem [shape: f32[1,128], index: 4, kind: input, shape index: {}]   ;;  %s656_s5 = inlined_call_operand.hbm [shape: f32[8,128], index: 5, kind: output, shape index: {}]  }
   0x1   :  { %11 = vsyncpa [#allocation6], 0 }
   0x2   :  { %12 = vsyncpa [#allocation4], 0  ;;  %s536_s18 = smov [#allocation5]   ;;  %s442_s22 = scalar_lea.hbm %s652_s1, 2048 }
   0x3   :  { %s28_s19 = sshll.u32 %s536_s18, 4  ;;  %p443_p0 = scmp.ne.s32.totalorder %s652_s1, %s442_s22  ;;  %s29_s19 = int_to_ptr.vmem [resolvable:$true] %s28_s19 }
   0x4   :  { %p446_p1 = scmp.lt.u32.totalorder %s442_s22, %s652_s1 }
   0x6   :  { %p448_p2 = pnand %p446_p1, %p443_p0 }
   0x8   :  { %451 = shalt.err (!%p448_p2)
}
   0x9   :  { %s452_s27 = scalar_lea.vmem %s29_s19, 2048  ;;  %p457_p4 = scmp.lt.s32.totalorder %s29_s19, %s29_s19 }
   0xa   :  { %p453_p3 = scmp.ne.s32.totalorder %s29_s19, %s452_s27  ;;  %p458_p5 = scmp.lt.s32.totalorder %s452_s27, %s452_s27 }
   0xc   :  { %p459_p6 = por %p458_p5, %p457_p4 }
   0xe   :  { %p460_p7 = pnand %p459_p6, %p453_p3 }
  0x10   :  { %463 = shalt.err (!%p460_p7)
}
  0x11   :  { %s537_s28 = smov 128   ;;  %s538_s29 = smov 8  }
  0x12   :  { %34 = dma.hbm_to_vmem [thread:$0]  %s652_s1, 2048, %s29_s19, [#allocation6], %s537_s28, %s537_s28, %s538_s29  }
  0x13   :  { %s539_s7 = smov [#allocation2]   ;;  %s540_s9 = smov [#allocation7]  }
  0x14   :  { %s19_s8 = sshll.u32 %s539_s7, 4  ;;  %s42_s10 = sshll.u32 %s540_s9, 4  ;;  %s20_s8 = int_to_ptr.vmem [resolvable:$true] %s19_s8  ;;  %s43_s10 = int_to_ptr.vmem [resolvable:$true] %s42_s10 }
  0x15   :  { %s464_s13 = scalar_lea.hbm %s651_s0, 128 }
  0x16   :  { %p465_p8 = scmp.ne.s32.totalorder %s651_s0, %s464_s13  ;;  %p468_p9 = scmp.lt.u32.totalorder %s464_s13, %s651_s0 }
  0x18   :  { %p470_p10 = pnand %p468_p9, %p465_p8 }
  0x1a   :  { %473 = shalt.err (!%p470_p10)
}
  0x1b   :  { %s474_s1 = scalar_lea.vmem %s20_s8, 128  ;;  %p479_p12 = scmp.lt.s32.totalorder %s20_s8, %s20_s8 }
  0x1c   :  { %p475_p11 = scmp.ne.s32.totalorder %s20_s8, %s474_s1  ;;  %p480_p13 = scmp.lt.s32.totalorder %s474_s1, %s474_s1 }
  0x1e   :  { %p481_p0 = por %p480_p13, %p479_p12 }
  0x20   :  { %p482_p1 = pnand %p481_p0, %p475_p11 }
  0x22   :  { %485 = shalt.err (!%p482_p1)
}
  0x23   :  { %22 = dma.hbm_to_vmem [thread:$0]  %s651_s0, 128, %s20_s8, [#allocation3]  }
  0x24   :  { %s486_s22 = scalar_lea.hbm %s654_s3, 2048 }
  0x25   :  { %p487_p2 = scmp.ne.s32.totalorder %s654_s3, %s486_s22  ;;  %p490_p3 = scmp.lt.u32.totalorder %s486_s22, %s654_s3 }
  0x27   :  { %p492_p4 = pnand %p490_p3, %p487_p2 }
  0x29   :  { %495 = shalt.err (!%p492_p4)
}
  0x2a   :  { %s496_s27 = scalar_lea.vmem %s43_s10, 2048  ;;  %p501_p6 = scmp.lt.s32.totalorder %s43_s10, %s43_s10 }
  0x2b   :  { %p497_p5 = scmp.ne.s32.totalorder %s43_s10, %s496_s27  ;;  %p502_p7 = scmp.lt.s32.totalorder %s496_s27, %s496_s27 }
  0x2d   :  { %p503_p8 = por %p502_p7, %p501_p6 }
  0x2f   :  { %p504_p9 = pnand %p503_p8, %p497_p5 }
  0x31   :  { %507 = shalt.err (!%p504_p9)
}
  0x32   :  { %48 = dma.hbm_to_vmem [thread:$0]  %s654_s3, 2048, %s43_s10, [#allocation6], %s537_s28, %s537_s28, %s538_s29  }
  0x33   :  { %530 = dma.done.wait [#allocation3], 128  }
  0x34   :  { %531 = vsyncadd [#allocation3], 4294967168 }
  0x35   :  { %532 = dma.done.wait [#allocation6], 4096  }
  0x36   :  { %533 = vsyncadd [#allocation6], 4294963200  ;;  %v541_v0 = vmov 0.0|0.0   ;;  %vm542_vm0 = vmmov 0   ;;  %v543_v1 = vmov 0.0   ;;  %v61_v2 = vld [vmem:[#allocation5] sm:$0xff] }
  0x37   :  { %381 = vmatprep.subr.bf16.mxu0 %v541_v0  ;;  %343 = vmatprep.mubr.msk.f32.mxu0 %vm542_vm0, %v543_v1  ;;  %v62_v3 = vld [vmem:[#allocation5 + $0x8] sm:$0xff]  ;;  %v63_v4 = vld [vmem:[#allocation5 + $0x10] sm:$0xff]  ;;  %v64_v6 = vld [vmem:[#allocation5 + $0x18] sm:$0xff] }
  0x38   :  { %405 = vmatprep.subr.bf16.mxu1 %v541_v0  ;;  %378 = vmatprep.mubr.msk.f32.mxu1 %vm542_vm0, %v543_v1  ;;  %v382_v5 = vpack.c.bf16 %v62_v3, %v61_v2  ;;  %v385_v7 = vpack.c.bf16 %v64_v6, %v63_v4  ;;  %v65_v8 = vld [vmem:[#allocation5 + $0x20] sm:$0xff]  ;;  %v66_v9 = vld [vmem:[#allocation5 + $0x28] sm:$0xff]  ;;  %v162_v12 = vld [vmem:[#allocation7 + $0x10] sm:$0xff] }
  0x39   :  { %v160_v10 = vld [vmem:[#allocation7] sm:$0xff]  ;;  %v161_v11 = vld [vmem:[#allocation7 + $0x8] sm:$0xff]  ;;  %v163_v13 = vld [vmem:[#allocation7 + $0x18] sm:$0xff]  ;;  %v388_v14 = vpack.c.bf16 %v66_v9, %v65_v8 }
  0x3a   :  { %383 = vmatpush3.bf16.msra.mxu0 %v382_v5  ;;  %v406_v15 = vpack.c.bf16 %v161_v11, %v160_v10  ;;  %v67_v16 = vld [vmem:[#allocation5 + $0x30] sm:$0xff]  ;;  %v68_v17 = vld [vmem:[#allocation5 + $0x38] sm:$0xff]  ;;  %v409_v18 = vpack.c.bf16 %v163_v13, %v162_v12  ;;  %v164_v19 = vld [vmem:[#allocation7 + $0x20] sm:$0xff] }
  0x3b   :  { %384 = vmatprep.subr.bf16.mxu0 %v541_v0  ;;  %v165_v20 = vld [vmem:[#allocation7 + $0x28] sm:$0xff]  ;;  %v391_v21 = vpack.c.bf16 %v68_v17, %v67_v16  ;;  %v69_v22 = vld [vmem:[#allocation5 + $0x40] sm:$0xff]  ;;  %v71_v26 = vld [vmem:[#allocation5 + $0x50] sm:$0xff] }
  0x3c   :  { %407 = vmatpush3.bf16.msra.mxu1 %v406_v15  ;;  %v70_v23 = vld [vmem:[#allocation5 + $0x48] sm:$0xff]  ;;  %v412_v24 = vpack.c.bf16 %v165_v20, %v164_v19  ;;  %v72_v27 = vld [vmem:[#allocation5 + $0x58] sm:$0xff]  ;;  %v73_v29 = vld [vmem:[#allocation5 + $0x60] sm:$0xff] }
  0x3d   :  { %408 = vmatprep.subr.bf16.mxu1 %v541_v0  ;;  %v394_v25 = vpack.c.bf16 %v70_v23, %v69_v22  ;;  %v397_v28 = vpack.c.bf16 %v72_v27, %v71_v26  ;;  %v74_v30 = vld [vmem:[#allocation5 + $0x68] sm:$0xff]  ;;  %v75_v32 = vld [vmem:[#allocation5 + $0x70] sm:$0xff]  ;;  %v76_v33 = vld [vmem:[#allocation5 + $0x78] sm:$0xff] }
  0x3e   :  { %386 = vmatpush3.bf16.msra.mxu0 %v385_v7  ;;  %v400_v31 = vpack.c.bf16 %v74_v30, %v73_v29  ;;  %v403_v34 = vpack.c.bf16 %v76_v33, %v75_v32  ;;  %v60_v35 = vld [vmem:[#allocation2] sm:$0xff]  ;;  %v166_v36 = vld [vmem:[#allocation7 + $0x30] sm:$0xff]  ;;  %v168_v39 = vld [vmem:[#allocation7 + $0x40] sm:$0xff] }
  0x3f   :  { %387 = vmatprep.subr.bf16.mxu0 %v541_v0  ;;  %v167_v37 = vld [vmem:[#allocation7 + $0x38] sm:$0xff]  ;;  %v169_v40 = vld [vmem:[#allocation7 + $0x48] sm:$0xff]  ;;  %v170_v42 = vld [vmem:[#allocation7 + $0x50] sm:$0xff] }
  0x40   :  { %410 = vmatpush3.bf16.msra.mxu1 %v409_v18  ;;  %v415_v38 = vpack.c.bf16 %v167_v37, %v166_v36  ;;  %v418_v41 = vpack.c.bf16 %v169_v40, %v168_v39  ;;  %v171_v43 = vld [vmem:[#allocation7 + $0x58] sm:$0xff]  ;;  %v172_v45 = vld [vmem:[#allocation7 + $0x60] sm:$0xff]  ;;  %v173_v46 = vld [vmem:[#allocation7 + $0x68] sm:$0xff] }
  0x41   :  { %411 = vmatprep.subr.bf16.mxu1 %v541_v0  ;;  %v421_v44 = vpack.c.bf16 %v171_v43, %v170_v42  ;;  %v424_v47 = vpack.c.bf16 %v173_v46, %v172_v45  ;;  %v174_v48 = vld [vmem:[#allocation7 + $0x70] sm:$0xff]  ;;  %v175_v49 = vld [vmem:[#allocation7 + $0x78] sm:$0xff] }
  0x42   :  { %389 = vmatpush3.bf16.msra.mxu0 %v388_v14  ;;  %v427_v50 = vpack.c.bf16 %v175_v49, %v174_v48  ;;  %v275_v51 = vld [vmem:[%s653_s2] ss:$0 sm:$0xff]  ;;  %s544_s2 = smov [#allocation8]  }
  0x43   :  { %390 = vmatprep.subr.bf16.mxu0 %v541_v0  ;;  %v276_v60 = vld [vmem:[%s655_s4] ss:$0 sm:$0xff]  ;;  %s265_s7 = sshll.u32 %s544_s2, 4  ;;  %s266_s7 = int_to_ptr.vmem [resolvable:$true] %s265_s7 }
  0x44   :  { %413 = vmatpush3.bf16.msra.mxu1 %v412_v24  ;;  %s508_s8 = scalar_lea.vmem %s266_s7, 128  ;;  %p513_p11 = scmp.lt.s32.totalorder %s266_s7, %s266_s7 }
  0x45   :  { %414 = vmatprep.subr.bf16.mxu1 %v541_v0  ;;  %p509_p10 = scmp.ne.s32.totalorder %s266_s7, %s508_s8  ;;  %p514_p12 = scmp.lt.s32.totalorder %s508_s8, %s508_s8 }
  0x46   :  { %392 = vmatpush3.bf16.msra.mxu0 %v391_v21 }
  0x47   :  { %393 = vmatprep.subr.bf16.mxu0 %v541_v0  ;;  %p515_p13 = por %p514_p12, %p513_p11 }
  0x48   :  { %416 = vmatpush3.bf16.msra.mxu1 %v415_v38 }
  0x49   :  { %417 = vmatprep.subr.bf16.mxu1 %v541_v0  ;;  %p516_p0 = pnand %p515_p13, %p509_p10 }
  0x4a   :  { %395 = vmatpush3.bf16.msra.mxu0 %v394_v25 }
  0x4b   :  { %396 = vmatprep.subr.bf16.mxu0 %v541_v0 }
  0x4c   :  { %419 = vmatpush3.bf16.msra.mxu1 %v418_v41 }
  0x4d   :  { %420 = vmatprep.subr.bf16.mxu1 %v541_v0 }
  0x4e   :  { %398 = vmatpush3.bf16.msra.mxu0 %v397_v28 }
  0x4f   :  { %399 = vmatprep.subr.bf16.mxu0 %v541_v0 }
  0x50   :  { %422 = vmatpush3.bf16.msra.mxu1 %v421_v44 }
  0x51   :  { %423 = vmatprep.subr.bf16.mxu1 %v541_v0 }
  0x52   :  { %401 = vmatpush3.bf16.msra.mxu0 %v400_v31 }
  0x53   :  { %402 = vmatprep.subr.bf16.mxu0 %v541_v0 }
  0x54   :  { %425 = vmatpush3.bf16.msra.mxu1 %v424_v47 }
  0x55   :  { %426 = vmatprep.subr.bf16.mxu1 %v541_v0 }
  0x56   :  { %404 = vmatpush3.bf16.msra.mxu0 %v403_v34 }
  0x58   :  { %428 = vmatpush3.bf16.msra.mxu1 %v427_v50 }
  0x59   :  { %344 = vmatmul.mubr.f32.vlgmr.msra.gmra.mrb[0].mxu0 %v60_v35 }
 0x12c   :  { %v150_v52 = vpop.f32.mrb[0].mxu0 }
 0x12d   :  { %v151_v53 = vadd.f32 %v275_v51, %v150_v52  ;;  %v345_v54 = vpop.f32.mrb[1].mxu0 }
 0x12f   :  { %v156_v55 = vmul.f32 0.70710677, %v151_v53  ;;  %v154_v57 = vmul.f32 0.5, %v151_v53 }
 0x131   :  { %438 = verf.f32 %v156_v55 }
 0x13b   :  { %v439_v56 = vpop.eup %438 }
 0x13c   :  { %v158_v58 = vadd.f32 1.0, %v439_v56 }
 0x13e   :  { %v159_v59 = vmul.f32 %v158_v58, %v154_v57 }
 0x140   :  { %379 = vmatmul.mubr.f32.vlgmr.msra.gmra.mrb[0].mxu1 %v159_v59 }
 0x213   :  { %v249_v61 = vpop.f32.mrb[0].mxu1 }
 0x214   :  { %v250_v62 = vadd.f32 %v276_v60, %v249_v61  ;;  %v380_v63 = vpop.f32.mrb[1].mxu1 }
 0x216   :  { %v254_v0 = vmul.f32 0.70710677, %v250_v62  ;;  %v253_v2 = vmul.f32 0.5, %v250_v62 }
 0x218   :  { %440 = verf.f32 %v254_v0 }
 0x222   :  { %v441_v1 = vpop.eup %440 }
 0x223   :  { %v256_v3 = vadd.f32 1.0, %v441_v1 }
 0x225   :  { %v257_v4 = vmul.f32 %v256_v3, %v253_v2 }
 0x227   :  { %258 = vst [vmem:[#allocation8] sm:$0xff] %v257_v4 }
 0x228   :  { %519 = shalt.err (!%p516_p0)
}
 0x229   :  { %s520_s10 = scalar_lea.hbm %s656_s5, 128 }
 0x22a   :  { %p521_p1 = scmp.ne.s32.totalorder %s656_s5, %s520_s10  ;;  %p524_p2 = scmp.lt.u32.totalorder %s520_s10, %s656_s5 }
 0x22c   :  { %p526_p3 = pnand %p524_p2, %p521_p1 }
 0x22e   :  { %529 = shalt.err (!%p526_p3)
}
 0x22f   :  { %268 = dma.vmem_to_hbm [thread:$0]  %s266_s7, 128, %s656_s5, [#allocation4]  }
 0x230   :  { %534 = dma.done.wait [#allocation4], 128  }
 0x231   :  { %535 = vsyncadd [#allocation4], 4294967168 }
 0x232   :  { %272 = vsyncpa [#allocation3], 1 }
 0x233   :  { %273 = vsyncpa [#allocation6], 1 }
 0x234   :  { %274 = vsyncpa [#allocation4], 1 }

// kernel: tpu_custom_call.1
= control target key start
LH: loop header
LB: loop body
LE: loop exit
PB: predicated region body
PF: predicated region fallthrough
CT: control target
= control target key end

     0   :  { %10 = vsyncpa [#allocation3], 0  ;;  %s651_s0 = inlined_call_operand.hbm [shape: f32[8,128], index: 0, kind: input, shape index: {}]   ;;  %s652_s1 = inlined_call_operand.hbm [shape: f32[128,128], index: 1, kind: input, shape index: {}]   ;;  %s653_s2 = inlined_call_operand.vmem [shape: f32[1,128], index: 2, kind: input, shape index: {}]   ;;  %s654_s3 = inlined_call_operand.hbm [shape: f32[128,128], index: 3, kind: input, shape index: {}]   ;;  %s655_s4 = inlined_call_operand.vmem [shape: f32[1,128], index: 4, kind: input, shape index: {}]   ;;  %s656_s5 = inlined_call_operand.hbm [shape: f32[8,128], index: 5, kind: output, shape index: {}]  }
   0x1   :  { %11 = vsyncpa [#allocation6], 0 }
   0x2   :  { %12 = vsyncpa [#allocation4], 0  ;;  %s536_s18 = smov [#allocation5]   ;;  %s442_s22 = scalar_lea.hbm %s652_s1, 2048 }
   0x3   :  { %s28_s19 = sshll.u32 %s536_s18, 4  ;;  %p443_p0 = scmp.ne.s32.totalorder %s652_s1, %s442_s22  ;;  %s29_s19 = int_to_ptr.vmem [resolvable:$true] %s28_s19 }
   0x4   :  { %p446_p1 = scmp.lt.u32.totalorder %s442_s22, %s652_s1 }
   0x6   :  { %p448_p2 = pnand %p446_p1, %p443_p0 }
   0x8   :  { %451 = shalt.err (!%p448_p2)
}
   0x9   :  { %s452_s27 = scalar_lea.vmem %s29_s19, 2048  ;;  %p457_p4 = scmp.lt.s32.totalorder %s29_s19, %s29_s19 }
   0xa   :  { %p453_p3 = scmp.ne.s32.totalorder %s29_s19, %s452_s27  ;;  %p458_p5 = scmp.lt.s32.totalorder %s452_s27, %s452_s27 }
   0xc   :  { %p459_p6 = por %p458_p5, %p457_p4 }
   0xe   :  { %p460_p7 = pnand %p459_p6, %p453_p3 }
  0x10   :  { %463 = shalt.err (!%p460_p7)
}
  0x11   :  { %s537_s28 = smov 128   ;;  %s538_s29 = smov 8  }
  0x12   :  { %34 = dma.hbm_to_vmem [thread:$0]  %s652_s1, 2048, %s29_s19, [#allocation6], %s537_s28, %s537_s28, %s538_s29  }
  0x13   :  { %s539_s7 = smov [#allocation2]   ;;  %s540_s9 = smov [#allocation7]  }
  0x14   :  { %s19_s8 = sshll.u32 %s539_s7, 4  ;;  %s42_s10 = sshll.u32 %s540_s9, 4  ;;  %s20_s8 = int_to_ptr.vmem [resolvable:$true] %s19_s8  ;;  %s43_s10 = int_to_ptr.vmem [resolvable:$true] %s42_s10 }
  0x15   :  { %s464_s13 = scalar_lea.hbm %s651_s0, 128 }
  0x16   :  { %p465_p8 = scmp.ne.s32.totalorder %s651_s0, %s464_s13  ;;  %p468_p9 = scmp.lt.u32.totalorder %s464_s13, %s651_s0 }
  0x18   :  { %p470_p10 = pnand %p468_p9, %p465_p8 }
  0x1a   :  { %473 = shalt.err (!%p470_p10)
}
  0x1b   :  { %s474_s1 = scalar_lea.vmem %s20_s8, 128  ;;  %p479_p12 = scmp.lt.s32.totalorder %s20_s8, %s20_s8 }
  0x1c   :  { %p475_p11 = scmp.ne.s32.totalorder %s20_s8, %s474_s1  ;;  %p480_p13 = scmp.lt.s32.totalorder %s474_s1, %s474_s1 }
  0x1e   :  { %p481_p0 = por %p480_p13, %p479_p12 }
  0x20   :  { %p482_p1 = pnand %p481_p0, %p475_p11 }
  0x22   :  { %485 = shalt.err (!%p482_p1)
}
  0x23   :  { %22 = dma.hbm_to_vmem [thread:$0]  %s651_s0, 128, %s20_s8, [#allocation3]  }
  0x24   :  { %s486_s22 = scalar_lea.hbm %s654_s3, 2048 }
  0x25   :  { %p487_p2 = scmp.ne.s32.totalorder %s654_s3, %s486_s22  ;;  %p490_p3 = scmp.lt.u32.totalorder %s486_s22, %s654_s3 }
  0x27   :  { %p492_p4 = pnand %p490_p3, %p487_p2 }
  0x29   :  { %495 = shalt.err (!%p492_p4)
}
  0x2a   :  { %s496_s27 = scalar_lea.vmem %s43_s10, 2048  ;;  %p501_p6 = scmp.lt.s32.totalorder %s43_s10, %s43_s10 }
  0x2b   :  { %p497_p5 = scmp.ne.s32.totalorder %s43_s10, %s496_s27  ;;  %p502_p7 = scmp.lt.s32.totalorder %s496_s27, %s496_s27 }
  0x2d   :  { %p503_p8 = por %p502_p7, %p501_p6 }
  0x2f   :  { %p504_p9 = pnand %p503_p8, %p497_p5 }
  0x31   :  { %507 = shalt.err (!%p504_p9)
}
  0x32   :  { %48 = dma.hbm_to_vmem [thread:$0]  %s654_s3, 2048, %s43_s10, [#allocation6], %s537_s28, %s537_s28, %s538_s29  }
  0x33   :  { %530 = dma.done.wait [#allocation3], 128  }
  0x34   :  { %531 = vsyncadd [#allocation3], 4294967168 }
  0x35   :  { %532 = dma.done.wait [#allocation6], 4096  }
  0x36   :  { %533 = vsyncadd [#allocation6], 4294963200  ;;  %v541_v0 = vmov 0.0|0.0   ;;  %vm542_vm0 = vmmov 0   ;;  %v543_v1 = vmov 0.0   ;;  %v61_v2 = vld [vmem:[#allocation5] sm:$0xff] }
  0x37   :  { %381 = vmatprep.subr.bf16.mxu0 %v541_v0  ;;  %343 = vmatprep.mubr.msk.f32.mxu0 %vm542_vm0, %v543_v1  ;;  %v62_v3 = vld [vmem:[#allocation5 + $0x8] sm:$0xff]  ;;  %v63_v4 = vld [vmem:[#allocation5 + $0x10] sm:$0xff]  ;;  %v64_v6 = vld [vmem:[#allocation5 + $0x18] sm:$0xff] }
  0x38   :  { %405 = vmatprep.subr.bf16.mxu1 %v541_v0  ;;  %378 = vmatprep.mubr.msk.f32.mxu1 %vm542_vm0, %v543_v1  ;;  %v382_v5 = vpack.c.bf16 %v62_v3, %v61_v2  ;;  %v385_v7 = vpack.c.bf16 %v64_v6, %v63_v4  ;;  %v65_v8 = vld [vmem:[#allocation5 + $0x20] sm:$0xff]  ;;  %v66_v9 = vld [vmem:[#allocation5 + $0x28] sm:$0xff]  ;;  %v162_v12 = vld [vmem:[#allocation7 + $0x10] sm:$0xff] }
  0x39   :  { %v160_v10 = vld [vmem:[#allocation7] sm:$0xff]  ;;  %v161_v11 = vld [vmem:[#allocation7 + $0x8] sm:$0xff]  ;;  %v163_v13 = vld [vmem:[#allocation7 + $0x18] sm:$0xff]  ;;  %v388_v14 = vpack.c.bf16 %v66_v9, %v65_v8 }
  0x3a   :  { %383 = vmatpush3.bf16.msra.mxu0 %v382_v5  ;;  %v406_v15 = vpack.c.bf16 %v161_v11, %v160_v10  ;;  %v67_v16 = vld [vmem:[#allocation5 + $0x30] sm:$0xff]  ;;  %v68_v17 = vld [vmem:[#allocation5 + $0x38] sm:$0xff]  ;;  %v409_v18 = vpack.c.bf16 %v163_v13, %v162_v12  ;;  %v164_v19 = vld [vmem:[#allocation7 + $0x20] sm:$0xff] }
  0x3b   :  { %384 = vmatprep.subr.bf16.mxu0 %v541_v0  ;;  %v165_v20 = vld [vmem:[#allocation7 + $0x28] sm:$0xff]  ;;  %v391_v21 = vpack.c.bf16 %v68_v17, %v67_v16  ;;  %v69_v22 = vld [vmem:[#allocation5 + $0x40] sm:$0xff]  ;;  %v71_v26 = vld [vmem:[#allocation5 + $0x50] sm:$0xff] }
  0x3c   :  { %407 = vmatpush3.bf16.msra.mxu1 %v406_v15  ;;  %v70_v23 = vld [vmem:[#allocation5 + $0x48] sm:$0xff]  ;;  %v412_v24 = vpack.c.bf16 %v165_v20, %v164_v19  ;;  %v72_v27 = vld [vmem:[#allocation5 + $0x58] sm:$0xff]  ;;  %v73_v29 = vld [vmem:[#allocation5 + $0x60] sm:$0xff] }
  0x3d   :  { %408 = vmatprep.subr.bf16.mxu1 %v541_v0  ;;  %v394_v25 = vpack.c.bf16 %v70_v23, %v69_v22  ;;  %v397_v28 = vpack.c.bf16 %v72_v27, %v71_v26  ;;  %v74_v30 = vld [vmem:[#allocation5 + $0x68] sm:$0xff]  ;;  %v75_v32 = vld [vmem:[#allocation5 + $0x70] sm:$0xff]  ;;  %v76_v33 = vld [vmem:[#allocation5 + $0x78] sm:$0xff] }
  0x3e   :  { %386 = vmatpush3.bf16.msra.mxu0 %v385_v7  ;;  %v400_v31 = vpack.c.bf16 %v74_v30, %v73_v29  ;;  %v403_v34 = vpack.c.bf16 %v76_v33, %v75_v32  ;;  %v60_v35 = vld [vmem:[#allocation2] sm:$0xff]  ;;  %v166_v36 = vld [vmem:[#allocation7 + $0x30] sm:$0xff]  ;;  %v168_v39 = vld [vmem:[#allocation7 + $0x40] sm:$0xff] }
  0x3f   :  { %387 = vmatprep.subr.bf16.mxu0 %v541_v0  ;;  %v167_v37 = vld [vmem:[#allocation7 + $0x38] sm:$0xff]  ;;  %v169_v40 = vld [vmem:[#allocation7 + $0x48] sm:$0xff]  ;;  %v170_v42 = vld [vmem:[#allocation7 + $0x50] sm:$0xff] }
  0x40   :  { %410 = vmatpush3.bf16.msra.mxu1 %v409_v18  ;;  %v415_v38 = vpack.c.bf16 %v167_v37, %v166_v36  ;;  %v418_v41 = vpack.c.bf16 %v169_v40, %v168_v39  ;;  %v171_v43 = vld [vmem:[#allocation7 + $0x58] sm:$0xff]  ;;  %v172_v45 = vld [vmem:[#allocation7 + $0x60] sm:$0xff]  ;;  %v173_v46 = vld [vmem:[#allocation7 + $0x68] sm:$0xff] }
  0x41   :  { %411 = vmatprep.subr.bf16.mxu1 %v541_v0  ;;  %v421_v44 = vpack.c.bf16 %v171_v43, %v170_v42  ;;  %v424_v47 = vpack.c.bf16 %v173_v46, %v172_v45  ;;  %v174_v48 = vld [vmem:[#allocation7 + $0x70] sm:$0xff]  ;;  %v175_v49 = vld [vmem:[#allocation7 + $0x78] sm:$0xff] }
  0x42   :  { %389 = vmatpush3.bf16.msra.mxu0 %v388_v14  ;;  %v427_v50 = vpack.c.bf16 %v175_v49, %v174_v48  ;;  %v275_v51 = vld [vmem:[%s653_s2] ss:$0 sm:$0xff]  ;;  %s544_s2 = smov [#allocation8]  }
  0x43   :  { %390 = vmatprep.subr.bf16.mxu0 %v541_v0  ;;  %v276_v60 = vld [vmem:[%s655_s4] ss:$0 sm:$0xff]  ;;  %s265_s7 = sshll.u32 %s544_s2, 4  ;;  %s266_s7 = int_to_ptr.vmem [resolvable:$true] %s265_s7 }
  0x44   :  { %413 = vmatpush3.bf16.msra.mxu1 %v412_v24  ;;  %s508_s8 = scalar_lea.vmem %s266_s7, 128  ;;  %p513_p11 = scmp.lt.s32.totalorder %s266_s7, %s266_s7 }
  0x45   :  { %414 = vmatprep.subr.bf16.mxu1 %v541_v0  ;;  %p509_p10 = scmp.ne.s32.totalorder %s266_s7, %s508_s8  ;;  %p514_p12 = scmp.lt.s32.totalorder %s508_s8, %s508_s8 }
  0x46   :  { %392 = vmatpush3.bf16.msra.mxu0 %v391_v21 }
  0x47   :  { %393 = vmatprep.subr.bf16.mxu0 %v541_v0  ;;  %p515_p13 = por %p514_p12, %p513_p11 }
  0x48   :  { %416 = vmatpush3.bf16.msra.mxu1 %v415_v38 }
  0x49   :  { %417 = vmatprep.subr.bf16.mxu1 %v541_v0  ;;  %p516_p0 = pnand %p515_p13, %p509_p10 }
  0x4a   :  { %395 = vmatpush3.bf16.msra.mxu0 %v394_v25 }
  0x4b   :  { %396 = vmatprep.subr.bf16.mxu0 %v541_v0 }
  0x4c   :  { %419 = vmatpush3.bf16.msra.mxu1 %v418_v41 }
  0x4d   :  { %420 = vmatprep.subr.bf16.mxu1 %v541_v0 }
  0x4e   :  { %398 = vmatpush3.bf16.msra.mxu0 %v397_v28 }
  0x4f   :  { %399 = vmatprep.subr.bf16.mxu0 %v541_v0 }
  0x50   :  { %422 = vmatpush3.bf16.msra.mxu1 %v421_v44 }
  0x51   :  { %423 = vmatprep.subr.bf16.mxu1 %v541_v0 }
  0x52   :  { %401 = vmatpush3.bf16.msra.mxu0 %v400_v31 }
  0x53   :  { %402 = vmatprep.subr.bf16.mxu0 %v541_v0 }
  0x54   :  { %425 = vmatpush3.bf16.msra.mxu1 %v424_v47 }
  0x55   :  { %426 = vmatprep.subr.bf16.mxu1 %v541_v0 }
  0x56   :  { %404 = vmatpush3.bf16.msra.mxu0 %v403_v34 }
  0x58   :  { %428 = vmatpush3.bf16.msra.mxu1 %v427_v50 }
  0x59   :  { %344 = vmatmul.mubr.f32.vlgmr.msra.gmra.mrb[0].mxu0 %v60_v35 }
 0x12c   :  { %v150_v52 = vpop.f32.mrb[0].mxu0 }
 0x12d   :  { %v151_v53 = vadd.f32 %v275_v51, %v150_v52  ;;  %v345_v54 = vpop.f32.mrb[1].mxu0 }
 0x12f   :  { %v156_v55 = vmul.f32 0.70710677, %v151_v53  ;;  %v154_v57 = vmul.f32 0.5, %v151_v53 }
 0x131   :  { %438 = verf.f32 %v156_v55 }
 0x13b   :  { %v439_v56 = vpop.eup %438 }
 0x13c   :  { %v158_v58 = vadd.f32 1.0, %v439_v56 }
 0x13e   :  { %v159_v59 = vmul.f32 %v158_v58, %v154_v57 }
 0x140   :  { %379 = vmatmul.mubr.f32.vlgmr.msra.gmra.mrb[0].mxu1 %v159_v59 }
 0x213   :  { %v249_v61 = vpop.f32.mrb[0].mxu1 }
 0x214   :  { %v250_v62 = vadd.f32 %v276_v60, %v249_v61  ;;  %v380_v63 = vpop.f32.mrb[1].mxu1 }
 0x216   :  { %v254_v0 = vmul.f32 0.70710677, %v250_v62  ;;  %v253_v2 = vmul.f32 0.5, %v250_v62 }
 0x218   :  { %440 = verf.f32 %v254_v0 }
 0x222   :  { %v441_v1 = vpop.eup %440 }
 0x223   :  { %v256_v3 = vadd.f32 1.0, %v441_v1 }
 0x225   :  { %v257_v4 = vmul.f32 %v256_v3, %v253_v2 }
 0x227   :  { %258 = vst [vmem:[#allocation8] sm:$0xff] %v257_v4 }
 0x228   :  { %519 = shalt.err (!%p516_p0)
}
 0x229   :  { %s520_s10 = scalar_lea.hbm %s656_s5, 128 }
 0x22a   :  { %p521_p1 = scmp.ne.s32.totalorder %s656_s5, %s520_s10  ;;  %p524_p2 = scmp.lt.u32.totalorder %s520_s10, %s656_s5 }
 0x22c   :  { %p526_p3 = pnand %p524_p2, %p521_p1 }
 0x22e   :  { %529 = shalt.err (!%p526_p3)
}
 0x22f   :  { %268 = dma.vmem_to_hbm [thread:$0]  %s266_s7, 128, %s656_s5, [#allocation4]  }
 0x230   :  { %534 = dma.done.wait [#allocation4], 128  }
 0x231   :  { %535 = vsyncadd [#allocation4], 4294967168 }
 0x232   :  { %272 = vsyncpa [#allocation3], 1 }
 0x233   :  { %273 = vsyncpa [#allocation6], 1 }
 0x234   :  { %274 = vsyncpa [#allocation4], 1 }

</bundles_post_ra>
